<compile_context>
chip_gen: v6e
topology: v6e:2x2x1
jax: 0.10.0
libtpu: 0.0.40
codegen_flags: <defaults>
</compile_context>

<pallas_src>
import functools

import jax
import jax.numpy as jnp
from jax import lax
from jax.experimental import pallas as pl
from jax.experimental.pallas import tpu as pltpu


def _round_up(x, m):
    return (x + m - 1) // m * m


def _make_tdnn_kernel(K, dilation, c_in_pad, tile_l, tile_win, num_co, tile_co,
                      negative_slope):
    merged = (c_in_pad % 128 == 0)   # K taps can be fused into one deep matmul

    def kernel(x_ref, w_ref, b_ref, o_ref):
        # x_ref: (1, L_pad, c_in_pad)      bf16, resident per batch element
        # w_ref: (K*c_in_pad, c_out_pad)   bf16, resident for the whole grid
        # b_ref: (1, c_out_pad)            f32,  resident
        # o_ref: (1, tile_l, tile_co)      output dtype
        l = pl.program_id(1)
        row0 = pl.multiple_of(l * tile_l, tile_l)       # aligned window start
        xwin = x_ref[0, pl.ds(row0, tile_win), :]       # (tile_win, c_in_pad)

        if num_co == 1:                                  # static full slice
            cols = slice(None)
        else:                                            # 128-aligned dyn slice
            co = pl.program_id(2)
            cols = pl.ds(pl.multiple_of(co * tile_co, tile_co), tile_co)

        if merged:
            # One K*C_in-deep MXU contraction (lane-axis concat of the taps).
            x_deep = jnp.concatenate(
                [xwin[k * dilation:k * dilation + tile_l, :] for k in range(K)],
                axis=-1)
            acc = jnp.dot(x_deep, w_ref[:, cols],
                          preferred_element_type=jnp.float32)
        else:
            # Small C_in: K accumulating sub-contractions, acc seeded by tap 0.
            acc = jnp.dot(xwin[0:tile_l, :], w_ref[0:c_in_pad, cols],
                          preferred_element_type=jnp.float32)
            for k in range(1, K):
                acc = acc + jnp.dot(
                    xwin[k * dilation:k * dilation + tile_l, :],
                    w_ref[k * c_in_pad:(k + 1) * c_in_pad, cols],
                    preferred_element_type=jnp.float32)

        acc = acc + b_ref[:, cols]                          # (1, tile_co) bcast
        acc = jnp.where(acc > 0, acc, negative_slope * acc)  # LeakyReLU
        o_ref[0] = acc.astype(o_ref.dtype)

    return kernel


@functools.partial(jax.jit, static_argnames=("context_size", "dilation",
                                             "negative_slope", "compute_dtype"))
def tdnn_layer(x, weight, bias, *, context_size, dilation,
               negative_slope=0.01, compute_dtype=jnp.bfloat16):
    """x: (N, C_in, L); weight: (C_out, C_in, K); bias: (C_out,) -> (N, C_out, L_out)."""
    N, C_in, L = x.shape
    C_out, C_in_w, K = weight.shape
    assert K == context_size and C_in_w == C_in
    halo = dilation * (K - 1)
    L_out = L - halo
    assert L_out > 0

    # ---- tile / padding choices ----------------------------------------
    tile_co = 256 if C_out >= 256 else 128     # lane-dense stores; v5e may use 128
    c_out_pad = _round_up(C_out, tile_co)
    num_co = c_out_pad // tile_co

    tile_l = min(512, _round_up(L_out, 8))
    num_l = -(-L_out // tile_l)
    # v7x has 2 TensorCores: keep at least 2 parallel grid steps.
    if N * num_l * num_co < 2 and L_out >= 16:
        tile_l = _round_up(-(-L_out // 2), 8)
        num_l = -(-L_out // tile_l)
    l_out_pad = num_l * tile_l

    c_in_pad = _round_up(C_in, 16)             # bf16 sublane packing
    tile_win = _round_up(tile_l + halo, 8)     # halo'd in-kernel window
    L_pad = _round_up((num_l - 1) * tile_l + tile_win, 16)

    # ---- wrapper-side layout plumbing (plain XLA transpose/pad only) ----
    x_t = jnp.transpose(x, (0, 2, 1)).astype(compute_dtype)        # (N, L, C_in)
    x_t = jnp.pad(x_t, ((0, 0), (0, L_pad - L), (0, c_in_pad - C_in)))

    w_t = jnp.transpose(weight, (2, 1, 0)).astype(compute_dtype)   # (K, C_in, C_out)
    w_t = jnp.pad(w_t, ((0, 0), (0, c_in_pad - C_in), (0, c_out_pad - C_out)))
    w_t = w_t.reshape(K * c_in_pad, c_out_pad)                     # tap-major rows

    b_t = jnp.pad(bias.astype(jnp.float32), (0, c_out_pad - C_out))
    b_t = b_t.reshape(1, c_out_pad)

    kernel = _make_tdnn_kernel(K, dilation, c_in_pad, tile_l, tile_win,
                               num_co, tile_co, negative_slope)

    cbytes = jnp.dtype(compute_dtype).itemsize
    obytes = x.dtype.itemsize
    flops = 2 * N * C_out * C_in * K * L_out
    bytes_accessed = int(N * L_pad * c_in_pad * cbytes
                         + K * c_in_pad * c_out_pad * cbytes
                         + c_out_pad * 4
                         + N * l_out_pad * c_out_pad * obytes)

    # Per-step VMEM estimate (pipeline double-buffers the inputs); only raise
    # the scoped limit when the resident operands actually need it.
    vmem_est = (2 * L_pad * c_in_pad * cbytes
                + 2 * K * c_in_pad * c_out_pad * cbytes
                + 2 * c_out_pad * 4
                + 2 * tile_l * tile_co * obytes
                + 2 * tile_l * tile_co * 4)
    cp = dict(dimension_semantics=("parallel", "parallel", "parallel"))
    if vmem_est > 12 * 1024 * 1024:
        cp["vmem_limit_bytes"] = min(int(vmem_est * 1.25) + (4 << 20), 64 << 20)

    out = pl.pallas_call(
        kernel,
        out_shape=jax.ShapeDtypeStruct((N, l_out_pad, c_out_pad), x.dtype),
        grid_spec=pltpu.PrefetchScalarGridSpec(
            num_scalar_prefetch=0,
            # co innermost; x block constant across (l, co), weight/bias constant
            # everywhere -> each input is DMA'd only when its block index changes.
            grid=(N, num_l, num_co),
            in_specs=[
                pl.BlockSpec((1, L_pad, c_in_pad), lambda b, l, co: (b, 0, 0)),
                pl.BlockSpec((K * c_in_pad, c_out_pad), lambda b, l, co: (0, 0)),
                pl.BlockSpec((1, c_out_pad), lambda b, l, co: (0, 0)),
            ],
            out_specs=pl.BlockSpec((1, tile_l, tile_co),
                                   lambda b, l, co: (b, l, co)),
        ),
        compiler_params=pltpu.CompilerParams(**cp),
        cost_estimate=pl.CostEstimate(flops=flops, transcendentals=0,
                                      bytes_accessed=bytes_accessed),
    )(x_t, w_t, b_t)

    out = out[:, :L_out, :C_out]             # strip L / C_out padding
    return jnp.transpose(out, (0, 2, 1))     # back to PyTorch NCL layout


if __name__ == "__main__":
    # Shapes consistent with TDNNLayer(input_dim, output_dim, context_size, dilation)
    batch, input_dim, output_dim = 2, 8, 16
    context_size, dilation, seq_len = 3, 2, 32

    key = jax.random.PRNGKey(0)
    kx, kw, kb = jax.random.split(key, 3)

    x = jax.random.normal(kx, (batch, input_dim, seq_len), dtype=jnp.float32)
    # PyTorch Conv1d-style init: U(-bound, bound), bound = 1/sqrt(C_in*K)
    bound = 1.0 / (input_dim * context_size) ** 0.5
    weight = jax.random.uniform(kw, (output_dim, input_dim, context_size),
                                minval=-bound, maxval=bound, dtype=jnp.float32)
    bias = jax.random.uniform(kb, (output_dim,),
                              minval=-bound, maxval=bound, dtype=jnp.float32)

    out = tdnn_layer(x, weight, bias,
                     context_size=context_size, dilation=dilation)
    out = jax.block_until_ready(out)

    l_out = seq_len - dilation * (context_size - 1)
    assert out.shape == (batch, output_dim, l_out)

    def ref_conv(xr, wr):
        r = lax.conv_general_dilated(
            xr, wr, window_strides=(1,), padding="VALID",
            rhs_dilation=(dilation,),
            dimension_numbers=("NCH", "OIH", "NCH"),
            precision=lax.Precision.HIGHEST)
        r = r + bias[None, :, None]
        return jnp.where(r > 0, r, 0.01 * r)

    # Tight check vs. a reference fed the same bf16-rounded inputs (kernel
    # accumulates in f32, so only summation order differs)...
    ref_bf16 = ref_conv(x.astype(jnp.bfloat16).astype(jnp.float32),
                        weight.astype(jnp.bfloat16).astype(jnp.float32))
    assert jnp.allclose(out, ref_bf16, atol=1e-3, rtol=1e-3)
    # ...and a loose sanity check vs. the full-f32 reference (bf16 input rounding).
    ref_f32 = ref_conv(x, weight)
    assert jnp.allclose(out, ref_f32, atol=5e-2, rtol=5e-2)

    print("KERNEL_OK")
</pallas_src>

<mosaic_0001>
module attributes {stable_mosaic.version = 11 : i64} {
  func.func @kernel(%arg0: i32, %arg1: i32, %arg2: i32, %arg3: memref<1x48x16xbf16, #tpu.memory_space<vmem>>, %arg4: memref<48x128xbf16, #tpu.memory_space<vmem>>, %arg5: memref<1x128xf32, #tpu.memory_space<vmem>>, %arg6: memref<1x32x128xf32, #tpu.memory_space<vmem>>) attributes {dimension_semantics = [#tpu.dimension_semantics<parallel>, #tpu.dimension_semantics<parallel>, #tpu.dimension_semantics<parallel>], iteration_bounds = array<i64: 2, 1, 1>, scalar_prefetch = 0 : i64, scratch_operands = 0 : i64, tpu.core_type = #tpu.core_type<tc>, window_params = [{transform_indices = @transform_0, window_bounds = array<i64: 1, 48, 16>}, {pipeline_mode = #tpu.pipeline_mode<synchronous>, transform_indices = @transform_1, window_bounds = array<i64: 48, 128>}, {pipeline_mode = #tpu.pipeline_mode<synchronous>, transform_indices = @transform_2, window_bounds = array<i64: 1, 128>}, {transform_indices = @transform_3, window_bounds = array<i64: 1, 32, 128>}]} {
    %c32_i32 = arith.constant 32 : i32
    %0 = arith.muli %arg1, %c32_i32 : i32
    %1 = tpu.assume_multiple %0, 32 : i32
    %c0 = arith.constant 0 : index
    %2 = arith.index_cast %1 : i32 to index
    %c0_0 = arith.constant 0 : index
    %3 = vector.load %arg3[%c0, %2, %c0_0] : memref<1x48x16xbf16, #tpu.memory_space<vmem>>, vector<1x40x16xbf16>
    %4 = vector.shape_cast %3 : vector<1x40x16xbf16> to vector<40x16xbf16>
    %5 = vector.extract_strided_slice %4 {offsets = [0, 0], sizes = [32, 16], strides = [1, 1]} : vector<40x16xbf16> to vector<32x16xbf16>
    %c0_1 = arith.constant 0 : index
    %c0_2 = arith.constant 0 : index
    %6 = vector.load %arg4[%c0_1, %c0_2] : memref<48x128xbf16, #tpu.memory_space<vmem>>, vector<16x128xbf16>
    %cst = arith.constant dense<0.000000e+00> : vector<32x128xf32>
    %7 = tpu.matmul %5, %6, %cst {dimension_numbers = #tpu.dot_dimension_numbers<[1], [0], [0], [1], [0, 0, 1, 1], [], []>} : vector<32x16xbf16>, vector<16x128xbf16>, vector<32x128xf32> -> vector<32x128xf32>
    %8 = vector.extract_strided_slice %4 {offsets = [2, 0], sizes = [32, 16], strides = [1, 1]} : vector<40x16xbf16> to vector<32x16xbf16>
    %c16 = arith.constant 16 : index
    %c0_3 = arith.constant 0 : index
    %9 = vector.load %arg4[%c16, %c0_3] : memref<48x128xbf16, #tpu.memory_space<vmem>>, vector<16x128xbf16>
    %cst_4 = arith.constant dense<0.000000e+00> : vector<32x128xf32>
    %10 = tpu.matmul %8, %9, %cst_4 {dimension_numbers = #tpu.dot_dimension_numbers<[1], [0], [0], [1], [0, 0, 1, 1], [], []>} : vector<32x16xbf16>, vector<16x128xbf16>, vector<32x128xf32> -> vector<32x128xf32>
    %11 = arith.addf %7, %10 : vector<32x128xf32>
    %12 = vector.extract_strided_slice %4 {offsets = [4, 0], sizes = [32, 16], strides = [1, 1]} : vector<40x16xbf16> to vector<32x16xbf16>
    %c32 = arith.constant 32 : index
    %c0_5 = arith.constant 0 : index
    %13 = vector.load %arg4[%c32, %c0_5] : memref<48x128xbf16, #tpu.memory_space<vmem>>, vector<16x128xbf16>
    %cst_6 = arith.constant dense<0.000000e+00> : vector<32x128xf32>
    %14 = tpu.matmul %12, %13, %cst_6 {dimension_numbers = #tpu.dot_dimension_numbers<[1], [0], [0], [1], [0, 0, 1, 1], [], []>} : vector<32x16xbf16>, vector<16x128xbf16>, vector<32x128xf32> -> vector<32x128xf32>
    %15 = arith.addf %11, %14 : vector<32x128xf32>
    %c0_7 = arith.constant 0 : index
    %c0_8 = arith.constant 0 : index
    %16 = vector.load %arg5[%c0_7, %c0_8] : memref<1x128xf32, #tpu.memory_space<vmem>>, vector<1x128xf32>
    %17 = vector.broadcast %16 : vector<1x128xf32> to vector<32x128xf32>
    %18 = arith.addf %15, %17 : vector<32x128xf32>
    %cst_9 = arith.constant 0.000000e+00 : f32
    %19 = vector.broadcast %cst_9 : f32 to vector<32x128xf32>
    %20 = arith.cmpf ogt, %18, %19 : vector<32x128xf32>
    %cst_10 = arith.constant 0.00999999977 : f32
    %21 = vector.broadcast %cst_10 : f32 to vector<32x128xf32>
    %22 = arith.mulf %21, %18 : vector<32x128xf32>
    %23 = arith.select %20, %18, %22 : vector<32x128xi1>, vector<32x128xf32>
    %c0_11 = arith.constant 0 : index
    %c0_12 = arith.constant 0 : index
    %c0_13 = arith.constant 0 : index
    %24 = vector.load %arg6[%c0_11, %c0_12, %c0_13] : memref<1x32x128xf32, #tpu.memory_space<vmem>>, vector<1x32x128xf32>
    %25 = vector.shape_cast %24 : vector<1x32x128xf32> to vector<32x128xf32>
    %26 = vector.shape_cast %23 : vector<32x128xf32> to vector<1x32x128xf32>
    tpu.vector_store %arg6[%c0_11, %c0_12, %c0_13], %26 {strides = array<i32>} : memref<1x32x128xf32, #tpu.memory_space<vmem>>, vector<1x32x128xf32>,
    return
  }
  func.func @transform_0(%arg0: i32, %arg1: i32, %arg2: i32) -> (i32, i32, i32) {
    %c0_i32 = arith.constant 0 : i32
    %c0_i32_0 = arith.constant 0 : i32
    %c0_i32_1 = arith.constant 0 : i32
    return %arg0, %c0_i32, %c0_i32_0 : i32, i32, i32
  }
  func.func @transform_1(%arg0: i32, %arg1: i32, %arg2: i32) -> (i32, i32) {
    %c0_i32 = arith.constant 0 : i32
    %c0_i32_0 = arith.constant 0 : i32
    %c0_i32_1 = arith.constant 0 : i32
    return %c0_i32, %c0_i32_0 : i32, i32
  }
  func.func @transform_2(%arg0: i32, %arg1: i32, %arg2: i32) -> (i32, i32) {
    %c0_i32 = arith.constant 0 : i32
    %c0_i32_0 = arith.constant 0 : i32
    %c0_i32_1 = arith.constant 0 : i32
    return %c0_i32, %c0_i32_0 : i32, i32
  }
  func.func @transform_3(%arg0: i32, %arg1: i32, %arg2: i32) -> (i32, i32, i32) {
    %c0_i32 = arith.constant 0 : i32
    return %arg0, %arg1, %arg2 : i32, i32, i32
  }
}

</mosaic_0001>

<bundles_post_ra>
// kernel: tdnn_layer.1
= control target key start
LH: loop header
LB: loop body
LE: loop exit
PB: predicated region body
PF: predicated region fallthrough
CT: control target
= control target key end

     0   :  { %s688_s12 = smov 0   ;;  %s690_s13 = smov 0   ;;  %s745_s0 = inlined_call_operand.vmem [shape: bf16[2,48,16], index: 0, kind: input, shape index: {}]   ;;  %s746_s1 = inlined_call_operand.vmem [shape: bf16[48,128], index: 1, kind: input, shape index: {}]   ;;  %s747_s2 = inlined_call_operand.vmem [shape: f32[1,128], index: 2, kind: input, shape index: {}]   ;;  %s748_s3 = inlined_call_operand.vmem [shape: f32[2,32,128], index: 3, kind: output, shape index: {}]  }
   0x1   :  { %s692_s14 = smov 0  }
   0x2 LB: > { %s32_s15 = sadd.s32 1, %s662_s13  ;;  %p566_p0 = scmp.ge.s32.totalorder %s666_s14, 1  ;;  %s666_s14 = sphi %s692_s14, %s13_s14   ;;  %s662_s13 = sphi %s690_s13, %s750_s13   ;;  %s658_s12 = sphi %s688_s12, %s749_s12  }
   0x3   : > { %p34_p1 = scmp.ge.s32.totalorder %s32_s15, 2  ;;  %p160_p2 = scmp.lt.s32.totalorder %s666_s14, 3 }
   0x5   : > { %s752_s15 = smov (%p34_p1, %s32_s15), 0  ;;  %p161_p3 = pnand %p566_p0, %p160_p2 }
   0x6   : > { %p191_p4 = scmp.lt.s32.totalorder (!%p161_p3), %s658_s12, 1 }
   0x7   : > { %164 = sbr.rel (%p161_p3) target bundleno = 237 (0xed), region = 32 }
   0xc   : > { %v638_v0 = vld [vmem:[%s746_s1 + $0x8] sm:$0xff]   ;;  %v639_v1 = vld [vmem:[%s746_s1] sm:$0xff]   ;;  %s754_s12 = smov (!%p191_p4, %s658_s12), 1  ;;  %v642_v2 = vld [vmem:[%s746_s1 + $0x10] sm:$0xff]   ;;  %vm249_vm0 = vcmask 130048   ;;  %vm237_vm1 = vcmask 1046528  }
   0xd   : > { %595 = vmatprep.subr.bf16.mxu0 %v638_v0  ;;  %601 = vmatprep.subr.bf16.mxu1 %v639_v1  ;;  %s613_s22 = smul.u32 24, %s754_s12  ;;  %vm368_vm2 = vcmask 1045504   ;;  %v582_v25 = vld [vmem:[%s747_s2] ss:$0 sm:$0xff]  ;;  %s585_s28 = sshll.u32 %s754_s12, 5 }
   0xe   : > { %596 = vmatpush3.bf16.msra.mxu0 %v638_v0  ;;  %602 = vmatpush3.bf16.msra.mxu1 %v639_v1  ;;  %s207_s4 = scalar_lea.vmem %s748_s3, %s585_s28 }
   0xf   : > { %607 = vmatprep.subr.bf16.mxu0 %v642_v2  ;;  %s195_s25 = scalar_lea.vmem %s745_s0, %s613_s22 }
  0x10   : > { %v640_v3 = vld [vmem:[%s195_s25] sm:$0xff]   ;;  %v641_v4 = vld [vmem:[%s195_s25 + $0x8] sm:$0xff]   ;;  %v643_v5 = vld [vmem:[%s195_s25 + $0x10] ss:$0 sps:$4 sm:$0xff]  }
  0x11   : > { %v238_v6 = vrot.slane %v640_v3, 1  ;;  %v239_v7 = vrot.slane %v641_v4, 1  ;;  %603 = vmatprep.mubr.msk.bf16.mxu1 %vm249_vm0, %v640_v3  ;;  %v369_v8 = vrot.slane %v640_v3, 2  ;;  %v370_v9 = vrot.slane %v641_v4, 2 }
  0x12   : > { %v241_v10 = vrot.slane %v643_v5, 1  ;;  %604 = vmatmul.mubr.msk.bf16.vlgmr.msra.gmra.mxu1 %vm249_vm0, %v641_v4  ;;  %v372_v14 = vrot.slane %v643_v5, 2 }
  0x13   : > { %v240_v11 = vsel %vm237_vm1, %v238_v6, %v239_v7  ;;  %v371_v12 = vsel %vm368_vm2, %v369_v8, %v370_v9 }
  0x14   : > { %597 = vmatprep.mubr.msk.bf16.mxu0 %vm249_vm0, %v240_v11  ;;  %v242_v13 = vsel %vm237_vm1, %v239_v7, %v241_v10  ;;  %v373_v15 = vsel %vm368_vm2, %v370_v9, %v372_v14 }
  0x15   : > { %598 = vmatmul.mubr.msk.bf16.vlgmr.msra.gmra.mxu0 %vm249_vm0, %v242_v13 }
  0x16   : > { %608 = vmatpush3.bf16.msra.mxu0 %v642_v2  ;;  %609 = vmatprep.mubr.msk.bf16.mxu0 %vm249_vm0, %v371_v12 }
  0x1d   : > { %610 = vmatmul.mubr.msk.bf16.vlgmr.msra.gmra.mxu0 %vm249_vm0, %v373_v15 }
  0xd2   : > { %v605_v16 = vpop.f32.mrf.mxu1 }
  0xd4   : > { %v351_v19 = vpop.f32.mrf.mxu1 }
  0xd5   : > { %v599_v17 = vpop.f32.mrf.mxu0 }
  0xd6   : > { %v360_v22 = vadd.f32 %v605_v16, %v599_v17  ;;  %v606_v23 = vpop.f32.mrf.mxu1 }
  0xd7   : > { %v290_v18 = vpop.f32.mrf.mxu0 }
  0xd8   : > { %v352_v26 = vadd.f32 %v351_v19, %v290_v18  ;;  %v354_v30 = vpop.f32.mrf.mxu1 }
  0xd9   : > { %v600_v20 = vpop.f32.mrf.mxu0 }
  0xda   : > { %v363_v29 = vadd.f32 %v606_v23, %v600_v20 }
  0xdb   : > { %v293_v21 = vpop.f32.mrf.mxu0 }
  0xdc   : > { %v355_v37 = vadd.f32 %v354_v30, %v293_v21 }
  0xdd   : > { %v611_v24 = vpop.f32.mrf.mxu0 }
  0xde   : > { %v437_v27 = vadd.f32 %v611_v24, %v360_v22 }
  0xdf   : > { %v420_v28 = vpop.f32.mrf.mxu0 }
  0xe0   : > { %v448_v31 = vadd.f32 %v582_v25, %v437_v27  ;;  %v435_v32 = vadd.f32 %v420_v28, %v352_v26 }
  0xe1   : > { %v612_v33 = vpop.f32.mrf.mxu0 }
  0xe2   : > { %vm452_vm3 = vcmp.gt.f32.partialorder %v448_v31, 0.0  ;;  %v456_v34 = vmul.f32 0.01, %v448_v31  ;;  %v446_v35 = vadd.f32 %v582_v25, %v435_v32  ;;  %v438_v36 = vadd.f32 %v612_v33, %v363_v29 }
  0xe3   : > { %v423_v38 = vpop.f32.mrf.mxu0 }
  0xe4   : > { %v460_v39 = vsel %vm452_vm3, %v448_v31, %v456_v34  ;;  %vm450_vm4 = vcmp.gt.f32.partialorder %v446_v35, 0.0  ;;  %v454_v40 = vmul.f32 0.01, %v446_v35  ;;  %v449_v41 = vadd.f32 %v582_v25, %v438_v36 }
  0xe5   : > { %464 = vst [vmem:[%s207_s4 + $0x10] sm:$0xff] %v460_v39  ;;  %v436_v42 = vadd.f32 %v423_v38, %v355_v37 }
  0xe6   : > { %v458_v43 = vsel %vm450_vm4, %v446_v35, %v454_v40  ;;  %vm453_vm5 = vcmp.gt.f32.partialorder %v449_v41, 0.0  ;;  %v457_v44 = vmul.f32 0.01, %v449_v41 }
  0xe7   : > { %462 = vst [vmem:[%s207_s4] sm:$0xff] %v458_v43  ;;  %v447_v45 = vadd.f32 %v582_v25, %v436_v42 }
  0xe8   : > { %v461_v46 = vsel %vm453_vm5, %v449_v41, %v457_v44 }
  0xe9   : > { %465 = vst [vmem:[%s207_s4 + $0x18] sm:$0xff] %v461_v46  ;;  %vm451_vm6 = vcmp.gt.f32.partialorder %v447_v45, 0.0  ;;  %v455_v47 = vmul.f32 0.01, %v447_v45 }
  0xeb   : > { %v459_v48 = vsel %vm451_vm6, %v447_v45, %v455_v47 }
  0xec   : > { %463 = vst [vmem:[%s207_s4 + $0x8] sm:$0xff] %v459_v48 }
  0xed PF: > { %s13_s14 = sadd.s32 1, %s666_s14   ;;  %s749_s12 = smov %s662_s13 }
  0xee   : > { %p10_p5 = scmp.ge.s32.totalorder %s13_s14, 4   ;;  %s750_s13 = smov %s752_s15 }
  0xf0   :  { %12 = sbr.rel (!%p10_p5) target bundleno = 2 (0x2), region = 63 }

</bundles_post_ra>
